<compile_context>
chip_gen: v6e
topology: v6e:2x2x1
jax: 0.10.0
libtpu: 0.0.40
codegen_flags: <defaults>
</compile_context>

<pallas_src>
import functools

import jax
import jax.numpy as jnp
from jax.experimental import pallas as pl
from jax.experimental.pallas import tpu as pltpu


def _round_up(n, m=128):
    return ((n + m - 1) // m) * m


# ---------------------------------------------------------------------------
# Pallas kernel body.
# refs = (x, [gamma, beta,] w0, b0, w1, b1, ..., w_last, b_last, out)
# Each grid step sees a (TB, in_dim) activation tile; weights are full arrays.
# ---------------------------------------------------------------------------
def _ffn_kernel(n_hidden_layers, use_layernorm, *refs):
    x_ref = refs[0]
    out_ref = refs[-1]

    h = x_ref[...]  # f32 activations
    idx = 1
    if use_layernorm:
        gamma = refs[idx][...]
        beta = refs[idx + 1][...]
        idx += 2
        mean = jnp.mean(h, axis=-1, keepdims=True)
        var = jnp.mean(jnp.square(h - mean), axis=-1, keepdims=True)
        h = (h - mean) * jax.lax.rsqrt(var + 1e-5) * gamma + beta

    p = refs[idx:-1]
    for i in range(n_hidden_layers):
        w = p[2 * i][...]          # bf16, VMEM-resident
        b = p[2 * i + 1][...]      # f32
        h = jnp.dot(h.astype(w.dtype), w,
                    preferred_element_type=jnp.float32) + b
        h = jnp.maximum(h, 0.0)    # ReLU on hidden layers only

    w_last = p[-2][...]
    b_last = p[-1][...]
    # Lane-dense (128-multiple wide) final store.
    out_ref[...] = jnp.dot(h.astype(w_last.dtype), w_last,
                           preferred_element_type=jnp.float32) + b_last


# ---------------------------------------------------------------------------
# Wrapper: batch-tiled pallas_call.
# ---------------------------------------------------------------------------
def feedforward_forward(x, padded_params, output_dim, ln_params=None,
                        tile_b=256, slice_output=True):
    """Runs FeedForwardNet.forward. Returns [B, output_dim] f32 (or the
    lane-padded [B, out_pad] slab if slice_output=False)."""
    n_hidden = len(padded_params) - 1
    use_ln = ln_params is not None

    B, in_dim = x.shape
    out_pad = padded_params[-1][0].shape[1]

    tb = min(tile_b, B)
    num_blocks = pl.cdiv(B, tb)

    inputs = [x]
    in_specs = [pl.BlockSpec((tb, in_dim), lambda i: (i, 0))]

    def _resident(arr):
        # Full-array block, constant index_map -> stays in VMEM across the grid.
        return pl.BlockSpec(arr.shape, lambda i: (0, 0))

    if use_ln:
        for a in ln_params:
            inputs.append(a)
            in_specs.append(_resident(a))
    for w, b in padded_params:
        inputs.append(w)
        in_specs.append(_resident(w))
        inputs.append(b)
        in_specs.append(_resident(b))

    out_specs = pl.BlockSpec((tb, out_pad), lambda i: (i, 0))

    # VMEM budget: double-buffered activation tiles + resident params + slack.
    act_bytes = 2 * (tb * in_dim + tb * out_pad) * 4 * 2  # in+out, 2 buffers
    param_bytes = sum(int(a.size) * a.dtype.itemsize for a in inputs[1:])
    vmem_limit = min(max(act_bytes + param_bytes + (8 << 20), 16 << 20), 48 << 20)

    # Cost hint for XLA scheduling.
    flops = 2 * B * sum(int(w.shape[0]) * int(w.shape[1])
                        for w, _ in padded_params)
    bytes_accessed = (x.size * 4 + param_bytes + B * out_pad * 4)
    cost = pl.CostEstimate(flops=flops,
                           transcendentals=B if use_ln else 0,
                           bytes_accessed=bytes_accessed)

    out = pl.pallas_call(
        functools.partial(_ffn_kernel, n_hidden, use_ln),
        out_shape=jax.ShapeDtypeStruct((B, out_pad), jnp.float32),
        grid=(num_blocks,),
        in_specs=in_specs,
        out_specs=out_specs,
        compiler_params=pltpu.CompilerParams(
            dimension_semantics=("parallel",),
            vmem_limit_bytes=vmem_limit),
        cost_estimate=cost,
    )(*inputs)

    if slice_output:
        # Under jit this slice fuses into the consumer; downstream code may
        # also consume the padded slab directly (slice_output=False).
        return out[:, :output_dim]
    return out


# ---------------------------------------------------------------------------
# Parameter construction matching FeedForwardNet.__init__ semantics:
#   every Linear: kaiming_normal_ weights (fan_in, relu gain sqrt(2)),
#                 default nn.Linear bias init U(-1/sqrt(fan_in), 1/sqrt(fan_in))
#   optional LayerNorm(input_dim): gamma=1, beta=0, eps=1e-5
# Weights are returned transposed vs PyTorch: shape (in_features, out_features).
# ---------------------------------------------------------------------------
def init_ffn_params(key, input_dim, hidden_sizes, output_dim, layernorm,
                    dtype=jnp.float32):
    layer_sizes = [input_dim] + list(hidden_sizes) + [output_dim]
    params = []
    for in_size, out_size in zip(layer_sizes[:-1], layer_sizes[1:]):
        key, kw, kb = jax.random.split(key, 3)
        std = (2.0 / in_size) ** 0.5  # kaiming_normal_ (fan_in, relu gain)
        w = std * jax.random.normal(kw, (in_size, out_size), dtype=dtype)
        bound = 1.0 / (in_size ** 0.5)
        b = jax.random.uniform(kb, (1, out_size), dtype=dtype,
                               minval=-bound, maxval=bound)
        params.append((w, b))
    ln_params = None
    if layernorm:
        ln_params = (jnp.ones((1, input_dim), dtype=dtype),
                     jnp.zeros((1, input_dim), dtype=dtype))
    return params, ln_params


def pad_params_for_kernel(params, weight_dtype=jnp.bfloat16):
    """Cast weights to the MXU-native dtype; zero-pad ONLY the final layer's
    output width to a multiple of 128 lanes (lane-dense final store). Padded
    columns stay exactly zero through bias-add (ReLU-only hidden net)."""
    padded = []
    last = len(params) - 1
    for li, (w, b) in enumerate(params):
        in_size, out_size = w.shape
        out_pad = _round_up(out_size, 128) if li == last else out_size
        w_p = jnp.zeros((in_size, out_pad), weight_dtype)
        w_p = w_p.at[:, :out_size].set(w.astype(weight_dtype))
        b_p = jnp.zeros((1, out_pad), jnp.float32).at[:, :out_size].set(b)
        padded.append((w_p, b_p))
    return padded


# ---------------------------------------------------------------------------
# Pure-JAX references.
# ---------------------------------------------------------------------------
def _reference_forward_padded(x, padded_params, ln_params):
    """Mimics the kernel's math exactly (bf16 dot inputs, f32 accumulate)."""
    h = x
    if ln_params is not None:
        gamma, beta = ln_params
        mean = jnp.mean(h, axis=-1, keepdims=True)
        var = jnp.mean(jnp.square(h - mean), axis=-1, keepdims=True)
        h = (h - mean) / jnp.sqrt(var + 1e-5) * gamma + beta
    for w, b in padded_params[:-1]:
        h = jnp.maximum(
            jnp.dot(h.astype(w.dtype), w,
                    preferred_element_type=jnp.float32) + b, 0.0)
    w, b = padded_params[-1]
    return jnp.dot(h.astype(w.dtype), w,
                   preferred_element_type=jnp.float32) + b


def _reference_forward_f32(x, params, ln_params):
    h = x
    if ln_params is not None:
        gamma, beta = ln_params
        mean = jnp.mean(h, axis=-1, keepdims=True)
        var = jnp.mean(jnp.square(h - mean), axis=-1, keepdims=True)
        h = (h - mean) / jnp.sqrt(var + 1e-5) * gamma + beta
    for w, b in params[:-1]:
        h = jnp.maximum(h @ w + b, 0.0)
    w, b = params[-1]
    return h @ w + b


if __name__ == "__main__":
    # Small shapes consistent with the module.
    B = 16
    input_dim = 32
    hidden_sizes = [32, 32]
    output_dim = 12
    use_layernorm = True  # args['layernorm'] = True path
    tile_b = 8            # -> grid=(2,), exercises the batch-tiled pipeline

    key = jax.random.PRNGKey(0)
    key, kx = jax.random.split(key)
    x = jax.random.normal(kx, (B, input_dim), dtype=jnp.float32)

    params, ln_params = init_ffn_params(
        key, input_dim, hidden_sizes, output_dim, use_layernorm)
    padded_params = pad_params_for_kernel(params)

    fwd = jax.jit(lambda xx: feedforward_forward(
        xx, padded_params, output_dim, ln_params, tile_b=tile_b))
    out = fwd(x)
    jax.block_until_ready(out)
    assert out.shape == (B, output_dim)

    # Exact-math reference (same bf16 casts) -> tight tolerance.
    ref_padded = _reference_forward_padded(x, padded_params, ln_params)
    ref_padded = ref_padded[:, :output_dim]
    assert jnp.allclose(out, ref_padded, atol=1e-3, rtol=1e-3), \
        float(jnp.max(jnp.abs(out - ref_padded)))

    # Semantic reference in full f32 -> loose tolerance (bf16 weight rounding).
    ref_f32 = _reference_forward_f32(x, params, ln_params)
    assert jnp.allclose(out, ref_f32, atol=5e-2, rtol=5e-2), \
        float(jnp.max(jnp.abs(out - ref_f32)))

    print("KERNEL_OK")
</pallas_src>

<mosaic_0001>
module attributes {stable_mosaic.version = 11 : i64} {
  func.func @_ffn_kernel(%arg0: i32, %arg1: memref<8x32xf32, #tpu.memory_space<vmem>>, %arg2: memref<1x32xf32, #tpu.memory_space<vmem>>, %arg3: memref<1x32xf32, #tpu.memory_space<vmem>>, %arg4: memref<32x32xbf16, #tpu.memory_space<vmem>>, %arg5: memref<1x32xf32, #tpu.memory_space<vmem>>, %arg6: memref<32x32xbf16, #tpu.memory_space<vmem>>, %arg7: memref<1x32xf32, #tpu.memory_space<vmem>>, %arg8: memref<32x128xbf16, #tpu.memory_space<vmem>>, %arg9: memref<1x128xf32, #tpu.memory_space<vmem>>, %arg10: memref<8x128xf32, #tpu.memory_space<vmem>>) attributes {dimension_semantics = [#tpu.dimension_semantics<parallel>], iteration_bounds = array<i64: 2>, scalar_prefetch = 0 : i64, scratch_operands = 0 : i64, tpu.core_type = #tpu.core_type<tc>, window_params = [{transform_indices = @transform_0, window_bounds = array<i64: 8, 32>}, {pipeline_mode = #tpu.pipeline_mode<synchronous>, transform_indices = @transform_1, window_bounds = array<i64: 1, 32>}, {pipeline_mode = #tpu.pipeline_mode<synchronous>, transform_indices = @transform_2, window_bounds = array<i64: 1, 32>}, {pipeline_mode = #tpu.pipeline_mode<synchronous>, transform_indices = @transform_3, window_bounds = array<i64: 32, 32>}, {pipeline_mode = #tpu.pipeline_mode<synchronous>, transform_indices = @transform_4, window_bounds = array<i64: 1, 32>}, {pipeline_mode = #tpu.pipeline_mode<synchronous>, transform_indices = @transform_5, window_bounds = array<i64: 32, 32>}, {pipeline_mode = #tpu.pipeline_mode<synchronous>, transform_indices = @transform_6, window_bounds = array<i64: 1, 32>}, {pipeline_mode = #tpu.pipeline_mode<synchronous>, transform_indices = @transform_7, window_bounds = array<i64: 32, 128>}, {pipeline_mode = #tpu.pipeline_mode<synchronous>, transform_indices = @transform_8, window_bounds = array<i64: 1, 128>}, {transform_indices = @transform_9, window_bounds = array<i64: 8, 128>}]} {
    %c0 = arith.constant 0 : index
    %c0_0 = arith.constant 0 : index
    %0 = vector.load %arg1[%c0, %c0_0] : memref<8x32xf32, #tpu.memory_space<vmem>>, vector<8x32xf32>
    %c0_1 = arith.constant 0 : index
    %c0_2 = arith.constant 0 : index
    %1 = vector.load %arg2[%c0_1, %c0_2] : memref<1x32xf32, #tpu.memory_space<vmem>>, vector<1x32xf32>
    %c0_3 = arith.constant 0 : index
    %c0_4 = arith.constant 0 : index
    %2 = vector.load %arg3[%c0_3, %c0_4] : memref<1x32xf32, #tpu.memory_space<vmem>>, vector<1x32xf32>
    %cst = arith.constant dense<0.000000e+00> : vector<8xf32>
    %3 = vector.multi_reduction <add>, %0, %cst [1] : vector<8x32xf32> to vector<8xf32>
    %4 = vector.shape_cast %3 : vector<8xf32> to vector<8x1xf32>
    %cst_5 = arith.constant 3.200000e+01 : f32
    %5 = vector.broadcast %cst_5 : f32 to vector<8x1xf32>
    %6 = arith.divf %4, %5 : vector<8x1xf32>
    %7 = vector.broadcast %6 : vector<8x1xf32> to vector<8x32xf32>
    %8 = arith.subf %0, %7 : vector<8x32xf32>
    %9 = arith.mulf %8, %8 : vector<8x32xf32>
    %cst_6 = arith.constant dense<0.000000e+00> : vector<8xf32>
    %10 = vector.multi_reduction <add>, %9, %cst_6 [1] : vector<8x32xf32> to vector<8xf32>
    %11 = vector.shape_cast %10 : vector<8xf32> to vector<8x1xf32>
    %cst_7 = arith.constant 3.200000e+01 : f32
    %12 = vector.broadcast %cst_7 : f32 to vector<8x1xf32>
    %13 = arith.divf %11, %12 : vector<8x1xf32>
    %14 = vector.broadcast %6 : vector<8x1xf32> to vector<8x32xf32>
    %15 = arith.subf %0, %14 : vector<8x32xf32>
    %cst_8 = arith.constant 9.99999974E-6 : f32
    %16 = vector.broadcast %cst_8 : f32 to vector<8x1xf32>
    %17 = arith.addf %13, %16 : vector<8x1xf32>
    %18 = math.rsqrt %17 : vector<8x1xf32>
    %19 = vector.broadcast %18 : vector<8x1xf32> to vector<8x32xf32>
    %20 = arith.mulf %15, %19 : vector<8x32xf32>
    %21 = vector.broadcast %1 : vector<1x32xf32> to vector<8x32xf32>
    %22 = arith.mulf %20, %21 : vector<8x32xf32>
    %23 = vector.broadcast %2 : vector<1x32xf32> to vector<8x32xf32>
    %24 = arith.addf %22, %23 : vector<8x32xf32>
    %c0_9 = arith.constant 0 : index
    %c0_10 = arith.constant 0 : index
    %25 = vector.load %arg4[%c0_9, %c0_10] : memref<32x32xbf16, #tpu.memory_space<vmem>>, vector<32x32xbf16>
    %c0_11 = arith.constant 0 : index
    %c0_12 = arith.constant 0 : index
    %26 = vector.load %arg5[%c0_11, %c0_12] : memref<1x32xf32, #tpu.memory_space<vmem>>, vector<1x32xf32>
    %27 = arith.truncf %24 : vector<8x32xf32> to vector<8x32xbf16>
    %cst_13 = arith.constant dense<0.000000e+00> : vector<8x32xf32>
    %28 = tpu.matmul %27, %25, %cst_13 {dimension_numbers = #tpu.dot_dimension_numbers<[1], [0], [0], [1], [0, 0, 1, 1], [], []>} : vector<8x32xbf16>, vector<32x32xbf16>, vector<8x32xf32> -> vector<8x32xf32>
    %29 = vector.broadcast %26 : vector<1x32xf32> to vector<8x32xf32>
    %30 = arith.addf %28, %29 : vector<8x32xf32>
    %cst_14 = arith.constant 0.000000e+00 : f32
    %31 = vector.broadcast %cst_14 : f32 to vector<8x32xf32>
    %32 = arith.maximumf %30, %31 : vector<8x32xf32>
    %c0_15 = arith.constant 0 : index
    %c0_16 = arith.constant 0 : index
    %33 = vector.load %arg6[%c0_15, %c0_16] : memref<32x32xbf16, #tpu.memory_space<vmem>>, vector<32x32xbf16>
    %c0_17 = arith.constant 0 : index
    %c0_18 = arith.constant 0 : index
    %34 = vector.load %arg7[%c0_17, %c0_18] : memref<1x32xf32, #tpu.memory_space<vmem>>, vector<1x32xf32>
    %35 = arith.truncf %32 : vector<8x32xf32> to vector<8x32xbf16>
    %cst_19 = arith.constant dense<0.000000e+00> : vector<8x32xf32>
    %36 = tpu.matmul %35, %33, %cst_19 {dimension_numbers = #tpu.dot_dimension_numbers<[1], [0], [0], [1], [0, 0, 1, 1], [], []>} : vector<8x32xbf16>, vector<32x32xbf16>, vector<8x32xf32> -> vector<8x32xf32>
    %37 = vector.broadcast %34 : vector<1x32xf32> to vector<8x32xf32>
    %38 = arith.addf %36, %37 : vector<8x32xf32>
    %cst_20 = arith.constant 0.000000e+00 : f32
    %39 = vector.broadcast %cst_20 : f32 to vector<8x32xf32>
    %40 = arith.maximumf %38, %39 : vector<8x32xf32>
    %c0_21 = arith.constant 0 : index
    %c0_22 = arith.constant 0 : index
    %41 = vector.load %arg8[%c0_21, %c0_22] : memref<32x128xbf16, #tpu.memory_space<vmem>>, vector<32x128xbf16>
    %c0_23 = arith.constant 0 : index
    %c0_24 = arith.constant 0 : index
    %42 = vector.load %arg9[%c0_23, %c0_24] : memref<1x128xf32, #tpu.memory_space<vmem>>, vector<1x128xf32>
    %43 = arith.truncf %40 : vector<8x32xf32> to vector<8x32xbf16>
    %cst_25 = arith.constant dense<0.000000e+00> : vector<8x128xf32>
    %44 = tpu.matmul %43, %41, %cst_25 {dimension_numbers = #tpu.dot_dimension_numbers<[1], [0], [0], [1], [0, 0, 1, 1], [], []>} : vector<8x32xbf16>, vector<32x128xbf16>, vector<8x128xf32> -> vector<8x128xf32>
    %45 = vector.broadcast %42 : vector<1x128xf32> to vector<8x128xf32>
    %46 = arith.addf %44, %45 : vector<8x128xf32>
    %c0_26 = arith.constant 0 : index
    %c0_27 = arith.constant 0 : index
    %47 = vector.load %arg10[%c0_26, %c0_27] : memref<8x128xf32, #tpu.memory_space<vmem>>, vector<8x128xf32>
    tpu.vector_store %arg10[%c0_26, %c0_27], %46 {strides = array<i32>} : memref<8x128xf32, #tpu.memory_space<vmem>>, vector<8x128xf32>,
    return
  }
  func.func @transform_0(%arg0: i32) -> (i32, i32) {
    %c0_i32 = arith.constant 0 : i32
    %c0_i32_0 = arith.constant 0 : i32
    return %arg0, %c0_i32 : i32, i32
  }
  func.func @transform_1(%arg0: i32) -> (i32, i32) {
    %c0_i32 = arith.constant 0 : i32
    %c0_i32_0 = arith.constant 0 : i32
    %c0_i32_1 = arith.constant 0 : i32
    return %c0_i32, %c0_i32_0 : i32, i32
  }
  func.func @transform_2(%arg0: i32) -> (i32, i32) {
    %c0_i32 = arith.constant 0 : i32
    %c0_i32_0 = arith.constant 0 : i32
    %c0_i32_1 = arith.constant 0 : i32
    return %c0_i32, %c0_i32_0 : i32, i32
  }
  func.func @transform_3(%arg0: i32) -> (i32, i32) {
    %c0_i32 = arith.constant 0 : i32
    %c0_i32_0 = arith.constant 0 : i32
    %c0_i32_1 = arith.constant 0 : i32
    return %c0_i32, %c0_i32_0 : i32, i32
  }
  func.func @transform_4(%arg0: i32) -> (i32, i32) {
    %c0_i32 = arith.constant 0 : i32
    %c0_i32_0 = arith.constant 0 : i32
    %c0_i32_1 = arith.constant 0 : i32
    return %c0_i32, %c0_i32_0 : i32, i32
  }
  func.func @transform_5(%arg0: i32) -> (i32, i32) {
    %c0_i32 = arith.constant 0 : i32
    %c0_i32_0 = arith.constant 0 : i32
    %c0_i32_1 = arith.constant 0 : i32
    return %c0_i32, %c0_i32_0 : i32, i32
  }
  func.func @transform_6(%arg0: i32) -> (i32, i32) {
    %c0_i32 = arith.constant 0 : i32
    %c0_i32_0 = arith.constant 0 : i32
    %c0_i32_1 = arith.constant 0 : i32
    return %c0_i32, %c0_i32_0 : i32, i32
  }
  func.func @transform_7(%arg0: i32) -> (i32, i32) {
    %c0_i32 = arith.constant 0 : i32
    %c0_i32_0 = arith.constant 0 : i32
    %c0_i32_1 = arith.constant 0 : i32
    return %c0_i32, %c0_i32_0 : i32, i32
  }
  func.func @transform_8(%arg0: i32) -> (i32, i32) {
    %c0_i32 = arith.constant 0 : i32
    %c0_i32_0 = arith.constant 0 : i32
    %c0_i32_1 = arith.constant 0 : i32
    return %c0_i32, %c0_i32_0 : i32, i32
  }
  func.func @transform_9(%arg0: i32) -> (i32, i32) {
    %c0_i32 = arith.constant 0 : i32
    %c0_i32_0 = arith.constant 0 : i32
    return %arg0, %c0_i32 : i32, i32
  }
}

</mosaic_0001>

<bundles_post_ra>
// kernel: _lambda_.1
= control target key start
LH: loop header
LB: loop body
LE: loop exit
PB: predicated region body
PF: predicated region fallthrough
CT: control target
= control target key end

     0   :  { %s1436_s0 = inlined_call_operand.hbm [shape: f32[16,32], index: 0, kind: input, shape index: {}]   ;;  %s1437_s1 = inlined_call_operand.vmem [shape: f32[1,32], index: 1, kind: input, shape index: {}]   ;;  %s1438_s2 = inlined_call_operand.vmem [shape: f32[1,32], index: 2, kind: input, shape index: {}]   ;;  %s1439_s3 = inlined_call_operand.hbm [shape: bf16[32,32], index: 3, kind: input, shape index: {}]   ;;  %s1440_s4 = inlined_call_operand.hbm [shape: f32[1,32], index: 4, kind: input, shape index: {}]   ;;  %s1441_s5 = inlined_call_operand.hbm [shape: bf16[32,32], index: 5, kind: input, shape index: {}]   ;;  %s1442_s6 = inlined_call_operand.hbm [shape: f32[1,32], index: 6, kind: input, shape index: {}]   ;;  %s1443_s7 = inlined_call_operand.vmem [shape: bf16[32,128], index: 7, kind: input, shape index: {}]   ;;  %s1444_s8 = inlined_call_operand.vmem [shape: f32[1,128], index: 8, kind: input, shape index: {}]   ;;  %s1445_s9 = inlined_call_operand.hbm [shape: f32[16,128], index: 9, kind: output, shape index: {}]  }
   0x1   :  { %1450 = sst [smem:[#allocation16_spill]] %s1439_s3 }
   0x2   :  { %1451 = sst [smem:[#allocation17_spill]] %s1440_s4 }
   0x3   :  { %1452 = sst [smem:[#allocation18_spill]] %s1441_s5 }
   0x4   :  { %1453 = sst [smem:[#allocation19_spill]] %s1442_s6 }
   0x5   :  { %14 = vsyncpa [#allocation3], 0 }
   0x6   :  { %16 = vsyncpa [#allocation3 + $0x1], 0 }
   0x7   :  { %17 = vsyncpa [#allocation6], 0 }
   0x8   :  { %18 = vsyncpa [#allocation9], 0 }
   0x9   :  { %19 = vsyncpa [#allocation4], 0 }
   0xa   :  { %21 = vsyncpa [#allocation4 + $0x1], 0  ;;  %s1193_s30 = smov 0   ;;  %s1195_s10 = smov 0  }
   0xb   :  { %s1197_s11 = smov 0   ;;  %s1199_s12 = smov 0  }
   0xc LB: > { %s1133_s13 = smov [#allocation5]   ;;  %s1214_s15 = sadd.s32 4294967295, %s1131_s12   ;;  %s1131_s12 = sphi %s1199_s12, %s1477_s12   ;;  %s1127_s11 = sphi %s1197_s11, %s1476_s11   ;;  %s1123_s10 = sphi %s1195_s10, %s1475_s10   ;;  %s1119_s30 = sphi %s1193_s30, %s1474_s30  }
   0xd   : > { %s270_s14 = sshll.u32 %s1133_s13, 4  ;;  %p762_p0 = scmp.ge.s32.totalorder %s1131_s12, 1  ;;  %s271_s14 = int_to_ptr.vmem [resolvable:$true] %s270_s14 }
   0xe   : > { %p1446_p1 = scmp.eq.s32.totalorder %s1214_s15, 0  ;;  %p252_p2 = scmp.lt.s32.totalorder %s1131_s12, 3 }
   0xf   : > { %s1134_s17 = smov [#allocation8]   ;;  %s1135_s20 = smov [#allocation7]  }
  0x10   : > { %p1219_p3 = pnand %p762_p0, %p252_p2  ;;  %s294_s18 = sshll.u32 %s1134_s17, 4  ;;  %s1232_s18 = int_to_ptr.vmem [resolvable:$true] %s294_s18 }
  0x11   : > { %s284_s21 = sshll.u32 %s1135_s20, 4  ;;  %s938_s22 = scalar_lea.vmem %s271_s14, 256  ;;  %s1234_s21 = int_to_ptr.vmem [resolvable:$true] %s284_s21 }
  0x12   : > { %s1454_s16 = scalar_select %p1219_p3, 1, 0 }
  0x13   : > { %p848_p5 = pneg %p1219_p3  ;;  %p939_p8 = scmp.ne.s32.totalorder %s271_s14, %s938_s22 }
  0x14   : > { %p946_p11 = scmp.lt.s32.totalorder %s271_s14, %s271_s14  ;;  %p947_p12 = scmp.lt.s32.totalorder %s938_s22, %s938_s22 }
  0x15   : > { %p1228_p6 = pnand %p848_p5, %p1446_p1 }
  0x16   : > { %p948_p13 = por %p947_p12, %p946_p11 }
  0x17   : > { %p929_p7 = pneg %p1228_p6 }
  0x19   : > { %p941_p9 = pnand %p939_p8, %p929_p7 }
  0x1b   : > { %p942_p10 = pneg %p941_p9 }
  0x1d   : > { %p949_p0 = pnand %p948_p13, %p942_p10 }
  0x1f   : > { %952 = shalt.err (!%p949_p0)
}
  0x20   : > { %s1136_s23 = smov 64   ;;  %s1137_s24 = smov 4  }
  0x21   : > { %s1456_s3 = sld [smem:[#allocation16_spill]]  ;;  %s964_s27 = scalar_lea.vmem %s1232_s18, 256 }
  0x22   : > { %p965_p2 = scmp.ne.s32.totalorder %s1232_s18, %s964_s27  ;;  %p972_p9 = scmp.lt.s32.totalorder %s1232_s18, %s1232_s18 }
  0x23   : > { %p973_p10 = scmp.lt.s32.totalorder %s964_s27, %s964_s27 }
  0x24   : > { %p967_p5 = pnand %p965_p2, %p929_p7 }
  0x25   : > { %p974_p11 = por %p973_p10, %p972_p9 }
  0x26   : > { %p968_p8 = pneg %p967_p5 }
  0x27   : > { %851 = dma.hbm_to_vmem [thread:$0]  (!%p1228_p6), %s1456_s3, 256, %s271_s14, [#allocation6], %s1136_s23, %s1136_s23, %s1137_s24  }
  0x28   : > { %p975_p12 = pnand %p974_p11, %p968_p8 }
  0x2a   : > { %978 = shalt.err (!%p975_p12)
}
  0x2b   : > { %s1457_s5 = sld [smem:[#allocation18_spill]]  ;;  %s990_s13 = scalar_lea.vmem %s1234_s21, 16 }
  0x2c   : > { %p991_p13 = scmp.ne.s32.totalorder %s1234_s21, %s990_s13  ;;  %s997_s14 = scalar_lea.vmem %s1234_s21, 32 }
  0x2d   : > { %p998_p5 = scmp.lt.s32.totalorder %s1234_s21, %s1234_s21  ;;  %p999_p8 = scmp.lt.s32.totalorder %s997_s14, %s990_s13 }
  0x2e   : > { %p993_p0 = pnand %p991_p13, %p929_p7 }
  0x2f   : > { %p1000_p9 = por %p999_p8, %p998_p5 }
  0x30   : > { %p994_p2 = pneg %p993_p0 }
  0x31   : > { %857 = dma.hbm_to_vmem [thread:$0]  (!%p1228_p6), %s1457_s5, 256, %s1232_s18, [#allocation9], %s1136_s23, %s1136_s23, %s1137_s24  }
  0x32   : > { %p1001_p10 = pnand %p1000_p9, %p994_p2 }
  0x34   : > { %1004 = shalt.err (!%p1001_p10)
}
  0x35   : > { %s1458_s4 = sld [smem:[#allocation17_spill]]  ;;  %s1138_s18 = smov [#allocation10]  }
  0x36   : > { %s308_s22 = sshll.u32 %s1138_s18, 4  ;;  %s309_s22 = int_to_ptr.vmem [resolvable:$true] %s308_s22 }
  0x37   : > { %s1016_s23 = scalar_lea.vmem %s309_s22, 16  ;;  %s1023_s24 = scalar_lea.vmem %s309_s22, 32 }
  0x38   : > { %p1017_p11 = scmp.ne.s32.totalorder %s309_s22, %s1016_s23  ;;  %p1024_p0 = scmp.lt.s32.totalorder %s309_s22, %s309_s22 }
  0x39   : > { %p1025_p2 = scmp.lt.s32.totalorder %s1023_s24, %s1016_s23 }
  0x3a   : > { %p1019_p12 = pnand %p1017_p11, %p929_p7 }
  0x3b   : > { %854 = dma.hbm_to_vmem [thread:$0]  (!%p1228_p6), %s1458_s4, 16, %s1234_s21, [#allocation6]  }
  0x3c   : > { %p1020_p13 = pneg %p1019_p12  ;;  %p1026_p5 = por %p1025_p2, %p1024_p0 }
  0x3e   : > { %p1027_p8 = pnand %p1026_p5, %p1020_p13 }
  0x40   : > { %1030 = shalt.err (!%p1027_p8)
}
  0x41   : > { %s1459_s6 = sld [smem:[#allocation19_spill]]  ;;  %s761_s21 = sadd.s32 4294967294, %s1131_s12  }
  0x42   : > { %s1283_s19 = sadd.s32 1, %s1131_s12   ;;  %s34_s28 = sadd.s32 1, %s1127_s11 }
  0x43   : > { %s31_s27 = ssub.s32 %s1131_s12, %s1283_s19  ;;  %p41_p9 = scmp.ne.s32.totalorder %s1127_s11, %s1123_s10 }
  0x44   : > { %p32_p7 = scmp.eq.s32.totalorder %s31_s27, 0  ;;  %p42_p10 = scmp.eq.s32.totalorder %s1131_s12, 0 }
  0x45   : > { %p47_p11 = scmp.ne.s32.totalorder %s1123_s10, %s1119_s30  ;;  %p239_p13 = scmp.eq.s32.totalorder %s1214_s15, 1 }
  0x46   : > { %s1294_s29 = scalar_select %p32_p7, %s1127_s11, %s34_s28  }
  0x47   : > { %860 = dma.hbm_to_vmem [thread:$0]  (!%p1228_p6), %s1459_s6, 16, %s309_s22, [#allocation9]  }
  0x48   : > { %p1296_p12 = por %p42_p10, %p41_p9  ;;  %p1302_p6 = por %p1446_p1, %p47_p11 }
  0x49   : > { %p245_p0 = scmp.eq.s32.totalorder %s761_s21, 1  ;;  %p873_p2 = scmp.lt.s32.totalorder %s1131_s12, 2 }
  0x4a   : > { %s1461_s14 = scalar_select %p1302_p6, 1, 0 }
  0x4b   : > { %s325_s17 = sand.u32 1, %s1127_s11   ;;  %p1309_p5 = por %p239_p13, %p41_p9 }
  0x4c   : > { %p1313_p8 = por %p245_p0, %p47_p11  ;;  %s768_s22 = sshll.u32 %s325_s17, 3 }
  0x4d   : > { %s1462_s20 = scalar_select %p1309_p5, 1, 0 }
  0x4e   : > { %s1463_s18 = scalar_select %p1313_p8, 1, 0 }
  0x4f   : > { %s769_s23 = sshll.u32 %s1131_s12, 7  ;;  %s329_s21 = scalar_lea.vmem [#allocation2], %s768_s22 }
  0x50   : > { %s1321_s26 = scalar_lea.hbm %s1436_s0, %s769_s23  ;;  %s336_s27 = sshll.u32 %s329_s21, 4  ;;  %s337_s27 = int_to_ptr.vmem [resolvable:$true] %s336_s27 }
  0x51   : > { %p1325_p7 = pnand %p873_p2, %p1296_p12  ;;  %s326_s3 = scalar_lea.sflag [#allocation3], %s325_s17 }
  0x52   : > { %s1031_s4 = scalar_lea.hbm %s1321_s26, 128  ;;  %s1036_s25 = scalar_lea.hbm %s1436_s0, 256 }
  0x53   : > { %p1032_p9 = scmp.ne.s32.totalorder %s1321_s26, %s1031_s4  ;;  %p1033_p10 = pneg %p1325_p7 }
  0x54   : > { %p1037_p0 = scmp.lt.s32.totalorder %s1321_s26, %s1436_s0  ;;  %p1038_p12 = scmp.lt.s32.totalorder %s1036_s25, %s1031_s4 }
  0x55   : > { %p1034_p11 = pnand %p1033_p10, %p1032_p9 }
  0x56   : > { %p1039_p2 = por %p1038_p12, %p1037_p0 }
  0x57   : > { %p1035_p13 = pneg %p1034_p11 }
  0x59   : > { %p1040_p4 = pnand %p1039_p2, %p1035_p13 }
  0x5b   : > { %1043 = shalt.err (!%p1040_p4)
}
  0x5c   : > { %s1044_s13 = scalar_lea.vmem %s337_s27, 128  ;;  %s1139_s17 = smov [#allocation2]  }
  0x5d   : > { %p1045_p1 = scmp.ne.s32.totalorder %s337_s27, %s1044_s13  ;;  %s1049_s5 = sshll.u32 %s1139_s17, 4  ;;  %s1050_s5 = int_to_ptr.vmem [resolvable:$false] %s1049_s5 }
  0x5e   : > { %s1051_s6 = scalar_lea.vmem %s1050_s5, 256  ;;  %p1052_p9 = scmp.lt.s32.totalorder %s337_s27, %s1050_s5 }
  0x5f   : > { %p1047_p8 = pnand %p1045_p1, %p1033_p10  ;;  %p1053_p11 = scmp.lt.s32.totalorder %s1051_s6, %s1044_s13 }
  0x61   : > { %p1048_p5 = pneg %p1047_p8  ;;  %p1054_p6 = por %p1053_p11, %p1052_p9 }
  0x63   : > { %p1055_p3 = pnand %p1054_p6, %p1048_p5 }
  0x65   : > { %1058 = shalt.err (!%p1055_p3)
}
  0x66   : > { %864 = dma.hbm_to_vmem [thread:$0]  (!%p1325_p7), %s1321_s26, 128, %s337_s27, %s326_s3  }
  0x67   : > { %p1465_p13 = scmp.ne.s32.totalorder %s1454_s16, 0 }
  0x68   : > { %s1346_s4 = sand.u32 (!%p1465_p13), 1, %s1123_s10   ;;  %p1466_p1 = scmp.ne.s32.totalorder (!%p1465_p13), %s1461_s14, 0 }
  0x69   : > { %345 = sbr.rel (%p1465_p13) target bundleno = 1035 (0x40b), region = 56  ;;  %s771_s23 = sshll.u32 (!%p1465_p13), %s1346_s4, 3 }
  0x6a   : > { %s348_s5 = scalar_lea.sflag (!%p1465_p13), [#allocation3], %s1346_s4  ;;  %s351_s6 = scalar_lea.vmem (!%p1465_p13), [#allocation2], %s771_s23 }
  0x6e   : > { %1102 = dma.done.wait (%p1466_p1), %s348_s5, 128  }
  0x6f   : > { %1104 = vsyncadd (%p1466_p1), %s348_s5, 4294967168  ;;  %p1467_p3 = scmp.eq.s32.totalorder %s1214_s15, 0 }
  0x71   : > { %1106 = dma.done.wait (%p1467_p3), [#allocation6], 272   ;;  %p1468_p4 = pmov %p1467_p3 }
  0x72   : > { %p1469_p6 = pmov %p1467_p3 }
  0x73   : > { %1108 = vsyncadd (%p1468_p4), [#allocation6], 4294967024 }
  0x74   : > { %1110 = dma.done.wait (%p1469_p6), [#allocation9], 272   ;;  %p1470_p5 = pmov %p1467_p3 }
  0x75   : > { %vm406_vm0 = vcmask 261120   ;;  %v403_v0 = vld [vmem:[%s351_s6] sm:$0xff]  ;;  %v919_v7 = vld [vmem:[#allocation5 + $0x8] sm:$0xff]   ;;  %v1140_v8 = vmov 0.0   ;;  %vm1141_vm1 = vmmov 0   ;;  %v920_v9 = vld [vmem:[#allocation5] sm:$0xff]  }
  0x76   : > { %1112 = vsyncadd (%p1470_p5), [#allocation9], 4294967024  ;;  %v407_v1 = vsel %vm406_vm0, %v403_v0, 0.0  ;;  %804 = vmatprep.subr.bf16.mxu0 %v1140_v8  ;;  %808 = vmatprep.mubr.msk.bf16.mxu0 %vm1141_vm1, %v1140_v8  ;;  %v777_v14 = vld [vmem:[%s1437_s1] ss:$0 sm:$0xff]  ;;  %v921_v20 = vld [vmem:[#allocation8 + $0x8] sm:$0xff]  }
  0x77   : > { %408 = vadd.xlane.f32.xlu0 %v407_v1  ;;  %805 = vmatpush3.bf16.msra.mxu0 %v919_v7  ;;  %v778_v16 = vld [vmem:[%s1438_s2] ss:$0 sm:$0xff]  ;;  %v922_v21 = vld [vmem:[#allocation8] sm:$0xff]   ;;  %v783_v32 = vld [vmem:[#allocation10] ss:$0 sm:$0xff]  ;;  %s792_s13 = sshll.u32 %s1214_s15, 7 }
  0x78   : > { %812 = vmatprep.subr.bf16.mxu1 %v1140_v8  ;;  %806 = vmatprep.subr.bf16.mxu0 %v1140_v8  ;;  %v923_v22 = vld [vmem:[%s1443_s7 + $0x8] sm:$0xff]   ;;  %v779_v23 = vld [vmem:[#allocation7] ss:$0 sm:$0xff]  ;;  %s401_s17 = scalar_lea.vmem [#allocation11], %s771_s23  ;;  %s1393_s16 = scalar_lea.hbm %s1445_s9, %s792_s13 }
  0x79   : > { %816 = vmatprep.mubr.msk.bf16.mxu1 %vm1141_vm1, %v1140_v8  ;;  %813 = vmatpush3.bf16.msra.mxu1 %v921_v20  ;;  %v924_v31 = vld [vmem:[%s1443_s7] sm:$0xff]   ;;  %s653_s5 = sshll.u32 %s401_s17, 4  ;;  %s640_s14 = scalar_lea.sflag [#allocation4], %s1346_s4  ;;  %s1395_s5 = int_to_ptr.vmem [resolvable:$true] %s653_s5 }
  0x7a   : > { %814 = vmatprep.subr.bf16.mxu1 %v1140_v8  ;;  %v787_v40 = vld [vmem:[%s1444_s8] ss:$0 sm:$0xff]  ;;  %s1059_s15 = scalar_lea.vmem %s1395_s5, 128  ;;  %p1471_p7 = scmp.ne.s32.totalorder %s1462_s20, 0 }
  0x7b   : > { %807 = vmatpush3.bf16.msra.mxu0 %v920_v9  ;;  %p1060_p8 = scmp.ne.s32.totalorder %s1395_s5, %s1059_s15  ;;  %s1142_s23 = smov [#allocation11]  }
  0x7c   : > { %820 = vmatprep.subr.bf16.mxu0 %v1140_v8  ;;  %s1063_s26 = sshll.u32 %s1142_s23, 4  ;;  %s1064_s26 = int_to_ptr.vmem [resolvable:$false] %s1063_s26 }
  0x7d   : > { %815 = vmatpush3.bf16.msra.mxu1 %v922_v21  ;;  %p1061_p10 = pnand %p1060_p8, %p1471_p7  ;;  %s1065_s27 = scalar_lea.vmem %s1064_s26, 256 }
  0x7e   : > { %p1066_p12 = scmp.lt.s32.totalorder %s1395_s5, %s1064_s26  ;;  %p1067_p2 = scmp.lt.s32.totalorder %s1065_s27, %s1059_s15 }
  0x7f   : > { %p1062_p0 = pneg %p1061_p10 }
  0x80   : > { %p1068_p9 = por %p1067_p2, %p1066_p12 }
  0x82   : > { %p1069_p11 = pnand %p1068_p9, %p1062_p0 }
 0x100   : > { %v409_v2 = vpop.xlane.xlu0 %408 }
 0x101   : > { %v411_v3 = vmul.f32 0.03125, %v409_v2 }
 0x103   : > { %v412_v4 = vsub.f32 %v403_v0, %v411_v3 }
 0x105   : > { %v413_v5 = vmul.f32 %v412_v4, %v412_v4 }
 0x107   : > { %v414_v6 = vsel %vm406_vm0, %v413_v5, 0.0 }
 0x108   : > { %415 = vadd.xlane.f32.xlu0 %v414_v6 }
 0x191   : > { %v416_v10 = vpop.xlane.xlu0 %415 }
 0x192   : > { %v417_v11 = vmul.f32 0.03125, %v416_v10 }
 0x194   : > { %v418_v12 = vadd.f32 1e-05, %v417_v11 }
 0x196   : > { %925 = vrsqrt.f32 %v418_v12 }
 0x1a3   : > { %v926_v13 = vpop.eup %925 }
 0x1a4   : > { %v420_v15 = vmul.f32 %v926_v13, %v412_v4 }
 0x1a6   : > { %v427_v17 = vmul.f32 %v777_v14, %v420_v15 }
 0x1a8   : > { %v434_v18 = vadd.f32 %v778_v16, %v427_v17 }
 0x1aa   : > { %v440_v19 = vpack.c.bf16 %v434_v18, %v434_v18 }
 0x1ac   : > { %809 = vmatmul.mubr.msk.bf16.vlgmr.msra.gmra.mxu0 %vm406_vm0, %v440_v19 }
 0x1ad   : > { %824 = vmatprep.mubr.msk.bf16.mxu0 %vm1141_vm1, %v1140_v8  ;;  %821 = vmatpush3.bf16.msra.mxu0 %v923_v22 }
 0x1ae   : > { %822 = vmatprep.subr.bf16.mxu0 %v1140_v8 }
 0x1b1   : > { %823 = vmatpush3.bf16.msra.mxu0 %v924_v31 }
 0x26c   : > { %v496_v24 = vpop.f32.mrf.mxu0 }
 0x26d   : > { %v497_v25 = vadd.f32 %v779_v23, %v496_v24 }
 0x26e   : > { %v810_v26 = vpop.f32.mrf.mxu0 }
 0x26f   : > { %v502_v27 = vmax.f32 %v497_v25, 0.0 }
 0x270   : > { %v499_v28 = vpop.f32.mrf.mxu0 }
 0x271   : > { %v508_v29 = vpack.c.bf16 %v502_v27, %v502_v27 }
 0x272   : > { %v811_v30 = vpop.f32.mrf.mxu0 }
 0x273   : > { %817 = vmatmul.mubr.msk.bf16.vlgmr.msra.gmra.mxu1 %vm406_vm0, %v508_v29 }
 0x333   : > { %v564_v33 = vpop.f32.mrf.mxu1 }
 0x334   : > { %v565_v34 = vadd.f32 %v783_v32, %v564_v33 }
 0x335   : > { %v818_v35 = vpop.f32.mrf.mxu1 }
 0x336   : > { %v570_v36 = vmax.f32 %v565_v34, 0.0 }
 0x337   : > { %v567_v37 = vpop.f32.mrf.mxu1 }
 0x338   : > { %v576_v38 = vpack.c.bf16 %v570_v36, %v570_v36 }
 0x339   : > { %v819_v39 = vpop.f32.mrf.mxu1 }
 0x33a   : > { %825 = vmatmul.mubr.msk.bf16.vlgmr.msra.gmra.mxu0 %vm406_vm0, %v576_v38 }
 0x3fa   : > { %v632_v41 = vpop.f32.mrf.mxu0 }
 0x3fb   : > { %v633_v42 = vadd.f32 %v787_v40, %v632_v41 }
 0x3fc   : > { %v826_v43 = vpop.f32.mrf.mxu0 }
 0x3fd   : > { %638 = vst [vmem:[%s401_s17] sm:$0xff] %v633_v42 }
 0x3fe   : > { %v635_v44 = vpop.f32.mrf.mxu0 }
 0x3ff   : > { %1072 = shalt.err (!%p1069_p11)
}
 0x400   : > { %s1073_s28 = scalar_lea.hbm %s1393_s16, 128  ;;  %s1077_s25 = scalar_lea.hbm %s1445_s9, 256 }
 0x401   : > { %p1074_p13 = scmp.ne.s32.totalorder %s1393_s16, %s1073_s28  ;;  %p1078_p4 = scmp.lt.s32.totalorder %s1393_s16, %s1445_s9 }
 0x402   : > { %p1079_p6 = scmp.lt.s32.totalorder %s1077_s25, %s1073_s28 }
 0x403   : > { %p1075_p1 = pnand %p1074_p13, %p1471_p7 }
 0x404   : > { %p1080_p5 = por %p1079_p6, %p1078_p4 }
 0x405   : > { %p1076_p3 = pneg %p1075_p1 }
 0x407   : > { %p1081_p8 = pnand %p1080_p5, %p1076_p3 }
 0x409   : > { %1084 = shalt.err (!%p1081_p8)
}
 0x40a   : > { %846 = dma.vmem_to_hbm [thread:$0]  (%p1471_p7), %s1395_s5, 128, %s1393_s16, %s640_s14   ;;  %v827_v45 = vpop.f32.mrf.mxu0 }
 0x40b PF: > { %s665_s13 = sand.u32 1, %s1119_s30   ;;  %p1472_p10 = scmp.ne.s32.totalorder %s1463_s18, 0 }
 0x40c   : > { %p1473_p0 = scmp.ge.s32.totalorder %s1131_s12, 2  ;;  %s666_s17 = scalar_lea.sflag [#allocation4], %s665_s13 }
 0x40e   : > { %p866_p12 = pnand %p1473_p0, %p1472_p10 }
 0x410   : > { %p867_p2 = pneg %p866_p12 }
 0x412   : > { %1114 = dma.done.wait (%p867_p2), %s666_s17, 128  }
 0x413   : > { %1116 = vsyncadd (%p867_p2), %s666_s17, 4294967168  ;;  %p24_p9 = scmp.ge.s32.totalorder %s1283_s19, 4   ;;  %s1474_s30 = smov %s1123_s10 }
 0x414   : > { %s1475_s10 = smov %s1127_s11  ;;  %s1476_s11 = smov %s1294_s29 }
 0x415   : > { %s1477_s12 = smov %s1283_s19  ;;  %26 = sbr.rel (!%p24_p9) target bundleno = 12 (0xc), region = 117 }
 0x41a   :  { %671 = vsyncpa [#allocation3], 1 }
 0x41b   :  { %673 = vsyncpa [#allocation3 + $0x1], 1 }
 0x41c   :  { %674 = vsyncpa [#allocation6], 1 }
 0x41d   :  { %675 = vsyncpa [#allocation9], 1 }
 0x41e   :  { %676 = vsyncpa [#allocation4], 1 }
 0x41f   :  { %678 = vsyncpa [#allocation4 + $0x1], 1 }

</bundles_post_ra>
